<compile_context>
chip_gen: v7x
topology: tpu7x:2x2x1
jax: 0.10.0
libtpu: 0.0.40
codegen_flags: <defaults>
</compile_context>

<pallas_src>
import functools

import jax
import jax.numpy as jnp
from jax.experimental import pallas as pl
from jax.experimental.pallas import tpu as pltpu


def _residual_conv1x1_kernel(x_ref, w_ref, b_ref, o_ref, *, compute_dtype):
    """fn(x) + x for fn = 1x1 conv, computed as W @ X in NCHW layout.

    x_ref: (Bt, C, block_s)  channels on sublanes, spatial on lanes
    w_ref: (C_out, C_in)     resident weight (compute_dtype)
    b_ref: (C_out, 1)        f32 bias, broadcasts over batch/lanes
    """
    x = x_ref[...]                                        # (Bt, C, S)
    y = jnp.einsum("oc,bcs->bos",                         # MXU channel mix
                   w_ref[...], x.astype(compute_dtype),
                   preferred_element_type=jnp.float32)    # (Bt, C, S) f32
    y = y + b_ref[...]                                    # (C,1) bias broadcast
    o_ref[...] = (y + x.astype(jnp.float32)).astype(o_ref.dtype)


def residual_conv1x1(x_nchw, weight, bias, *, block_spatial=2048,
                     compute_dtype=jnp.bfloat16):
    """Residual(Conv2d(C, C, kernel_size=1)) forward, NCHW in / NCHW out.

    weight: (C_out, C_in) — torch Conv2d weight[..., 0, 0]
    bias:   (C_out,)
    Output dtype == input dtype (keep activations bf16 end-to-end for the
    memory-bound fast path; the kernel never upcasts the HBM traffic).
    """
    B, C, H, W = x_nchw.shape
    HW = H * W
    x3d = x_nchw.reshape(B, C, HW)                        # free view, stays NCHW

    w = weight.astype(compute_dtype)                      # (C_out, C_in), resident
    b2d = bias.reshape(C, 1).astype(jnp.float32)

    x_bytes = x3d.dtype.itemsize
    w_bytes = jnp.dtype(compute_dtype).itemsize

    # --- generation-aware VMEM budget --------------------------------------
    try:
        vmem_cap = int(pltpu.get_tpu_info().vmem_capacity_bytes)
    except Exception:                                     # conservative: v7x
        vmem_cap = 64 * 1024 * 1024
    vmem_budget = (vmem_cap * 3) // 4                     # ~48 MiB v7x, ~96 MiB v5e/v6e

    # --- small-C batch folding: fill sublanes / amortize per-step overhead --
    sublane = max(1, 32 // x_bytes)                       # 8 for f32, 16 for bf16
    bt = min(B, max(1, sublane // C)) if C < sublane else 1

    # --- spatial tile (lane axis): lane-dense, prefer divisor of HW ---------
    if HW <= block_spatial:
        block_s = HW                                      # full extent always legal
    else:
        base = max(128, (block_spatial // 128) * 128)
        block_s = next((c for c in range(base, 127, -128) if HW % c == 0), base)

    def _tile_bytes(bs, bt_):
        # double-buffered x/out/weight/bias tiles + Mosaic internal scratch slack
        return (2 * 2 * bt_ * C * bs * x_bytes            # x + out, 2-deep each
                + 2 * C * C * w_bytes                     # weight (still 2-buffered)
                + 2 * C * 4                               # bias
                + (1 << 20))                              # internal scratch slack

    # shrink only if the real footprint would blow the generation's budget
    while _tile_bytes(block_s, bt) > vmem_budget:
        if block_s >= 256:
            block_s = max(128, ((block_s // 2) // 128) * 128)
        elif bt > 1:
            bt -= 1
        else:
            break

    # keep >= 2 parallel grid iterations so v7x's 2nd TensorCore has work
    while pl.cdiv(B, bt) * pl.cdiv(HW, block_s) < 2:
        if HW >= 256 and block_s > 128:
            block_s = max(128, (pl.cdiv(HW, 2) // 128) * 128)
        elif bt > 1:
            bt -= 1
        else:
            break

    grid = (pl.cdiv(B, bt), pl.cdiv(HW, block_s))

    vmem_limit = int(min(max(2 * _tile_bytes(block_s, bt), 32 * 1024 * 1024),
                         vmem_budget))

    cost = pl.CostEstimate(
        flops=2 * B * C * C * HW + 2 * B * C * HW,
        transcendentals=0,
        bytes_accessed=2 * B * C * HW * x_bytes + C * C * w_bytes + C * 4)

    kernel = functools.partial(_residual_conv1x1_kernel,
                               compute_dtype=compute_dtype)

    out3d = pl.pallas_call(
        kernel,
        out_shape=jax.ShapeDtypeStruct((B, C, HW), x3d.dtype),
        grid=grid,
        in_specs=[
            pl.BlockSpec((bt, C, block_s), lambda bi, si: (bi, 0, si)),  # x tile
            pl.BlockSpec((C, C), lambda bi, si: (0, 0)),                 # W (resident)
            pl.BlockSpec((C, 1), lambda bi, si: (0, 0)),                 # bias (resident)
        ],
        out_specs=pl.BlockSpec((bt, C, block_s), lambda bi, si: (bi, 0, si)),
        compiler_params=pltpu.CompilerParams(
            dimension_semantics=("parallel", "parallel"),  # both axes independent
            vmem_limit_bytes=vmem_limit),
        cost_estimate=cost,
    )(x3d, w, b2d)

    return out3d.reshape(B, C, H, W)


def make_residual_conv1x1(weight, bias, *, block_spatial=2048,
                          compute_dtype=jnp.bfloat16):
    """Hoist the weight/bias dtype prep out of the per-call path."""
    w = jnp.asarray(weight, compute_dtype)
    b = jnp.asarray(bias, jnp.float32)

    def fwd(x, *args, **kwargs):
        return residual_conv1x1(x, w, b, block_spatial=block_spatial,
                                compute_dtype=compute_dtype)
    return fwd


class Residual:
    """Mirror of the PyTorch Residual wrapper: forward(x) = fn(x) + x,
    with the whole expression fused inside the Pallas kernel."""

    def __init__(self, fused_forward):
        self.fused_forward = fused_forward

    def __call__(self, x, *args, **kwargs):
        return self.fused_forward(x, *args, **kwargs)


def _reference_bf16(x_nchw, weight, bias, compute_dtype=jnp.bfloat16):
    """Pure-JAX reference matching the kernel's bf16-matmul / f32-accumulate path."""
    B, C, H, W = x_nchw.shape
    x3d = x_nchw.reshape(B, C, H * W)
    y = jnp.einsum("oc,bcs->bos",
                   weight.astype(compute_dtype), x3d.astype(compute_dtype),
                   preferred_element_type=jnp.float32)
    y = y + bias.reshape(1, C, 1).astype(jnp.float32) + x3d.astype(jnp.float32)
    return y.reshape(B, C, H, W).astype(x_nchw.dtype)


def _reference_f32(x_nchw, weight, bias):
    """Full-precision reference for semantic sanity (loose tolerance vs bf16 kernel)."""
    B, C, H, W = x_nchw.shape
    x3d = x_nchw.reshape(B, C, H * W).astype(jnp.float32)
    y = jnp.einsum("oc,bcs->bos", weight.astype(jnp.float32), x3d)
    y = y + bias.reshape(1, C, 1).astype(jnp.float32) + x3d
    return y.reshape(B, C, H, W).astype(x_nchw.dtype)


if __name__ == "__main__":
    key = jax.random.PRNGKey(0)
    kx, kw, kb = jax.random.split(key, 3)

    B, C, H, W = 2, 4, 16, 16
    x = jax.random.normal(kx, (B, C, H, W), dtype=jnp.float32)

    # deterministic synthetic parameters for the wrapped fn (1x1 conv)
    fan_in = C
    bound = 1.0 / (fan_in ** 0.5)
    weight = jax.random.uniform(kw, (C, C), jnp.float32, -bound, bound)
    bias = jax.random.uniform(kb, (C,), jnp.float32, -bound, bound)

    residual_block = Residual(make_residual_conv1x1(weight, bias))

    # f32 activation path
    out = jax.block_until_ready(residual_block(x))
    ref_bf16 = _reference_bf16(x, weight, bias)
    ref_f32 = _reference_f32(x, weight, bias)

    assert out.shape == (B, C, H, W)
    assert out.dtype == x.dtype
    assert jnp.allclose(out, ref_bf16, atol=2e-3, rtol=2e-3), \
        "mismatch vs bf16-compute reference"
    assert jnp.allclose(out, ref_f32, atol=5e-2, rtol=5e-2), \
        "mismatch vs f32 reference"

    # bf16 activation I/O path (the memory-bound fast path: half the HBM bytes)
    x_bf16 = x.astype(jnp.bfloat16)
    out_bf16 = jax.block_until_ready(residual_block(x_bf16))
    assert out_bf16.dtype == jnp.bfloat16
    assert jnp.allclose(out_bf16.astype(jnp.float32),
                        _reference_f32(x_bf16, weight, bias).astype(jnp.float32),
                        atol=5e-2, rtol=5e-2), "mismatch on bf16 I/O path"

    print("KERNEL_OK")
</pallas_src>

<mosaic_0001>
module attributes {stable_mosaic.version = 11 : i64} {
  func.func @_residual_conv1x1_kernel(%arg0: i32, %arg1: i32, %arg2: memref<2x4x128xf32, #tpu.memory_space<vmem>>, %arg3: memref<4x4xbf16, #tpu.memory_space<vmem>>, %arg4: memref<4x1xf32, #tpu.memory_space<vmem>>, %arg5: memref<2x4x128xf32, #tpu.memory_space<vmem>>) attributes {dimension_semantics = [#tpu.dimension_semantics<parallel>, #tpu.dimension_semantics<parallel>], iteration_bounds = array<i64: 1, 2>, scalar_prefetch = 0 : i64, scratch_operands = 0 : i64, tpu.core_type = #tpu.core_type<tc>, window_params = [{transform_indices = @transform_0, window_bounds = array<i64: 2, 4, 128>}, {pipeline_mode = #tpu.pipeline_mode<synchronous>, transform_indices = @transform_1, window_bounds = array<i64: 4, 4>}, {pipeline_mode = #tpu.pipeline_mode<synchronous>, transform_indices = @transform_2, window_bounds = array<i64: 4, 1>}, {transform_indices = @transform_3, window_bounds = array<i64: 2, 4, 128>}]} {
    %c0 = arith.constant 0 : index
    %c0_0 = arith.constant 0 : index
    %c0_1 = arith.constant 0 : index
    %0 = vector.load %arg2[%c0, %c0_0, %c0_1] : memref<2x4x128xf32, #tpu.memory_space<vmem>>, vector<2x4x128xf32>
    %c0_2 = arith.constant 0 : index
    %c0_3 = arith.constant 0 : index
    %1 = vector.load %arg3[%c0_2, %c0_3] : memref<4x4xbf16, #tpu.memory_space<vmem>>, vector<4x4xbf16>
    %2 = arith.truncf %0 : vector<2x4x128xf32> to vector<2x4x128xbf16>
    "tpu.trace_start"() <{level = 10 : i32, message = "oc,bcs->bos"}> : () -> ()
    %cst = arith.constant dense<0.000000e+00> : vector<2x128x4xf32>
    %3 = tpu.matmul %2, %1, %cst {dimension_numbers = #tpu.dot_dimension_numbers<[1], [1], [0, 2], [0], [0, 0, 0, 2, 1, 0], [], []>} : vector<2x4x128xbf16>, vector<4x4xbf16>, vector<2x128x4xf32> -> vector<2x128x4xf32>
    %4 = tpu.transpose %3, [0, 2, 1] : vector<2x128x4xf32> -> vector<2x4x128xf32>
    "tpu.trace_stop"() : () -> ()
    %c0_4 = arith.constant 0 : index
    %c0_5 = arith.constant 0 : index
    %5 = vector.load %arg4[%c0_4, %c0_5] : memref<4x1xf32, #tpu.memory_space<vmem>>, vector<4x1xf32>
    %6 = vector.shape_cast %5 : vector<4x1xf32> to vector<1x4x1xf32>
    %7 = vector.broadcast %6 : vector<1x4x1xf32> to vector<2x4x128xf32>
    %8 = arith.addf %4, %7 : vector<2x4x128xf32>
    %9 = arith.addf %8, %0 : vector<2x4x128xf32>
    %c0_6 = arith.constant 0 : index
    %c0_7 = arith.constant 0 : index
    %c0_8 = arith.constant 0 : index
    %10 = vector.load %arg5[%c0_6, %c0_7, %c0_8] : memref<2x4x128xf32, #tpu.memory_space<vmem>>, vector<2x4x128xf32>
    tpu.vector_store %arg5[%c0_6, %c0_7, %c0_8], %9 {strides = array<i32>} : memref<2x4x128xf32, #tpu.memory_space<vmem>>, vector<2x4x128xf32>,
    return
  }
  func.func @transform_0(%arg0: i32, %arg1: i32) -> (i32, i32, i32) {
    %c0_i32 = arith.constant 0 : i32
    %c0_i32_0 = arith.constant 0 : i32
    return %arg0, %c0_i32, %arg1 : i32, i32, i32
  }
  func.func @transform_1(%arg0: i32, %arg1: i32) -> (i32, i32) {
    %c0_i32 = arith.constant 0 : i32
    %c0_i32_0 = arith.constant 0 : i32
    %c0_i32_1 = arith.constant 0 : i32
    return %c0_i32, %c0_i32_0 : i32, i32
  }
  func.func @transform_2(%arg0: i32, %arg1: i32) -> (i32, i32) {
    %c0_i32 = arith.constant 0 : i32
    %c0_i32_0 = arith.constant 0 : i32
    %c0_i32_1 = arith.constant 0 : i32
    return %c0_i32, %c0_i32_0 : i32, i32
  }
  func.func @transform_3(%arg0: i32, %arg1: i32) -> (i32, i32, i32) {
    %c0_i32 = arith.constant 0 : i32
    %c0_i32_0 = arith.constant 0 : i32
    return %arg0, %c0_i32, %arg1 : i32, i32, i32
  }
}

</mosaic_0001>

<bundles_post_ra>
// kernel: tpu_custom_call.1
= control target key start
LH: loop header
LB: loop body
LE: loop exit
PB: predicated region body
PF: predicated region fallthrough
CT: control target
= control target key end

     0   :  { %8 = vsyncpa [#allocation3], 0  ;;  %s1146_s0 = inlined_call_operand.hbm [shape: f32[2,4,256], index: 0, kind: input, shape index: {}]   ;;  %s1147_s1 = inlined_call_operand.vmem [shape: bf16[4,4], index: 1, kind: input, shape index: {}]   ;;  %s1148_s2 = inlined_call_operand.vmem [shape: f32[4,1], index: 2, kind: input, shape index: {}]   ;;  %s1149_s3 = inlined_call_operand.hbm [shape: f32[2,4,256], index: 3, kind: output, shape index: {}]  }
   0x1   :  { %10 = vsyncpa [#allocation3 + $0x1], 0 }
   0x2   :  { %11 = vsyncpa [#allocation4], 0 }
   0x3   :  { %13 = vsyncpa [#allocation4 + $0x1], 0  ;;  %s934_s12 = smov 0   ;;  %s936_s13 = smov 0  }
   0x4   :  { %s938_s14 = smov 0   ;;  %s940_s15 = smov 0  }
   0x5   :  { %s942_s16 = smov 0   ;;  %s944_s17 = smov 0  }
   0x6 LB: > { %s637_s18 = sadd.s32 4294967295, %s903_s17   ;;  %s638_s19 = sadd.s32 4294967294, %s903_s17   ;;  %s903_s17 = sphi %s944_s17, %s19_s17   ;;  %s899_s16 = sphi %s942_s16, %s1163_s16   ;;  %s895_s15 = sphi %s940_s15, %s1162_s15   ;;  %s891_s14 = sphi %s938_s14, %s1161_s14   ;;  %s887_s13 = sphi %s936_s13, %s1160_s13   ;;  %s883_s12 = sphi %s934_s12, %s1159_s12  }
   0x7   : > { %s28_s20 = sadd.s32 1, %s899_s16  ;;  %s40_s21 = sadd.s32 1, %s891_s14 }
   0x8   : > { %p29_p0 = scmp.ge.s32.totalorder %s28_s20, 2  ;;  %p47_p1 = scmp.ne.s32.totalorder %s891_s14, %s887_s13 }
   0x9   : > { %p48_p2 = scmp.eq.s32.totalorder %s903_s17, 0  ;;  %p53_p3 = scmp.ne.s32.totalorder %s887_s13, %s883_s12 }
   0xa   : > { %s1165_s20 = smov (%p29_p0, %s28_s20), 0  ;;  %p54_p5 = scmp.eq.s32.totalorder %s637_s18, 0 }
   0xb   : > { %p975_p4 = por %p48_p2, %p47_p1  ;;  %s36_s23 = ssub.s32 %s899_s16, %s1165_s20 }
   0xc   : > { %p121_p6 = scmp.eq.s32.totalorder %s637_s18, 1  ;;  %p38_p7 = scmp.eq.s32.totalorder %s36_s23, 0 }
   0xd   : > { %p981_p8 = por %p54_p5, %p53_p3  ;;  %p127_p10 = scmp.eq.s32.totalorder %s638_s19, 1 }
   0xe   : > { %p985_p9 = por %p121_p6, %p47_p1  ;;  %p733_p13 = scmp.lt.s32.totalorder %s903_s17, 2 }
   0xf   : > { %s990_s26 = scalar_select %p38_p7, %s891_s14, %s40_s21  }
  0x10   : > { %s1153_s25 = scalar_select %p985_p9, 1, 0 }
  0x11   : > { %p992_p11 = por %p127_p10, %p53_p3  ;;  %s153_s28 = sand.u32 1, %s891_s14  }
  0x12   : > { %s641_s29 = sshll.u32 %s153_s28, 3  ;;  %s642_s30 = sshll.u32 %s899_s16, 6 }
  0x13   : > { %s1154_s27 = scalar_select %p992_p11, 1, 0 }
  0x14   : > { %s1003_s6 = scalar_lea.hbm %s1146_s0, %s642_s30  ;;  %s157_s7 = scalar_lea.vmem [#allocation2], %s641_s29 }
  0x15   : > { %s166_s8 = sshll.u32 %s157_s7, 4  ;;  %p1009_p0 = pnand %p733_p13, %p975_p4  ;;  %s1005_s8 = int_to_ptr.vmem [resolvable:$true] %s166_s8 }
  0x16   : > { %s1013_s10 = scalar_lea.sflag [#allocation3], %s153_s28  ;;  %s791_s11 = scalar_lea.hbm %s1003_s6, 128 }
  0x17   : > { %p792_p1 = scmp.ne.s32.totalorder %s1003_s6, %s791_s11  ;;  %p793_p2 = pneg %p1009_p0 }
  0x18   : > { %s796_s21 = scalar_lea.hbm %s1146_s0, 256  ;;  %p797_p4 = scmp.lt.u32.totalorder %s1003_s6, %s1146_s0 }
  0x19   : > { %p794_p3 = pnand %p793_p2, %p792_p1  ;;  %p798_p6 = scmp.lt.u32.totalorder %s796_s21, %s791_s11 }
  0x1a   : > { %p800_p10 = scmp.lt.u32.totalorder %s791_s11, %s1003_s6 }
  0x1b   : > { %p795_p5 = pneg %p794_p3  ;;  %p799_p7 = por %p798_p6, %p797_p4 }
  0x1d   : > { %p801_p13 = por %p800_p10, %p799_p7 }
  0x1f   : > { %p802_p12 = pnand %p801_p13, %p795_p5 }
  0x21   : > { %805 = shalt.err (!%p802_p12)
}
  0x22   : > { %s806_s28 = scalar_lea.vmem %s1005_s8, 128  ;;  %s905_s29 = smov [#allocation2]  }
  0x23   : > { %p807_p1 = scmp.ne.s32.totalorder %s1005_s8, %s806_s28  ;;  %s811_s30 = sshll.u32 %s905_s29, 4  ;;  %s812_s30 = int_to_ptr.vmem [resolvable:$false] %s811_s30 }
  0x24   : > { %s813_s4 = scalar_lea.vmem %s812_s30, 256  ;;  %p814_p9 = scmp.lt.s32.totalorder %s1005_s8, %s812_s30 }
  0x25   : > { %p809_p3 = pnand %p807_p1, %p793_p2  ;;  %p815_p4 = scmp.lt.s32.totalorder %s813_s4, %s806_s28 }
  0x27   : > { %p810_p11 = pneg %p809_p3  ;;  %p816_p6 = por %p815_p4, %p814_p9 }
  0x29   : > { %p817_p7 = pnand %p816_p6, %p810_p11 }
  0x2b   : > { %820 = shalt.err (!%p817_p7)
}
  0x2c   : > { %s906_s5 = smov 128   ;;  %s907_s7 = smov 64  }
  0x2d   : > { %s908_s11 = smov 4   ;;  %p643_p12 = scmp.ge.s32.totalorder %s903_s17, 1 }
  0x2e   : > { %728 = dma.hbm_to_vmem [thread:$0]  (!%p1009_p0), %s1003_s6, 128, %s1005_s8, %s1013_s10, %s906_s5, %s907_s7, %s908_s11  }
  0x2f   : > { %p174_p2 = scmp.lt.s32.totalorder %s903_s17, 3 }
  0x31   : > { %p175_p5 = pnand %p643_p12, %p174_p2 }
  0x32   : > { %s1044_s18 = sand.u32 (!%p175_p5), 1, %s887_s13  }
  0x33   : > { %178 = sbr.rel (%p175_p5) target bundleno = 596 (0x254), region = 32  ;;  %s644_s19 = sshll.u32 (!%p175_p5), %s1044_s18, 3 }
  0x34   : > { %s181_s21 = scalar_lea.sflag (!%p175_p5), [#allocation3], %s1044_s18  ;;  %s184_s22 = scalar_lea.vmem (!%p175_p5), [#allocation2], %s644_s19 }
  0x3a   : > { %874 = dma.done.wait (%p981_p8), %s181_s21, 128  }
  0x3b   : > { %876 = vsyncadd (%p981_p8), %s181_s21, 4294967168  ;;  %vm247_vm0 = vcmask 31744   ;;  %v1054_v0 = vld [vmem:[%s184_s22] sm:$0xf]  ;;  %v1064_v4 = vld [vmem:[%s184_s22 + $0x4] sm:$0xf] }
  0x3c   : > { %v212_v1 = vld [vmem:[%s1147_s1] sm:$0x3]  ;;  %v213_v2 = vpack.c.bf16 %v1054_v0, %v1054_v0  ;;  %v214_v5 = vpack.c.bf16 %v1064_v4, %v1064_v4  ;;  %v909_v22 = vmov 0   ;;  %s206_s10 = scalar_lea.vmem [#allocation5], %s644_s19  ;;  %s663_s28 = sshll.u32 %s895_s15, 6 }
  0x3d   : > { %719 = vmatprep.subr.msk.bf16.mxu0 %vm247_vm0, %v212_v1  ;;  %v297_v3 = vsel %vm247_vm0, %v212_v1, 0  ;;  %720 = vmatprep.subr.msk.bf16.mxu1 %vm247_vm0, %v212_v1  ;;  %v524_v23 = vld [vmem:[%s1148_s2] sm:$0xf]  ;;  %s552_s23 = sshll.u32 %s206_s10, 4  ;;  %s1096_s4 = scalar_lea.hbm %s1149_s3, %s663_s28  ;;  %s1091_s23 = int_to_ptr.vmem [resolvable:$true] %s552_s23 }
  0x3e   : > { %684 = vmatpush3.bf16.xpose.msra.mxu0 %v297_v3  ;;  %718 = vmatpush3.bf16.xpose.msra.mxu1 %v297_v3  ;;  %s537_s5 = scalar_lea.sflag [#allocation4], %s1044_s18  ;;  %s821_s7 = scalar_lea.vmem %s1091_s23, 128 }
  0x3f   : > { %215 = vxpose.xlu0.c.b16.start.end [1/1] (short) %v213_v2, 128  ;;  %p822_p8 = scmp.ne.s32.totalorder %s1091_s23, %s821_s7  ;;  %p1156_p9 = scmp.ne.s32.totalorder %s1153_s25, 0 }
  0x40   : > { %s910_s15 = smov [#allocation5]  }
  0x41   : > { %p823_p11 = pnand %p822_p8, %p1156_p9  ;;  %s825_s11 = sshll.u32 %s910_s15, 4  ;;  %s826_s11 = int_to_ptr.vmem [resolvable:$false] %s825_s11 }
  0x42   : > { %s827_s19 = scalar_lea.vmem %s826_s11, 256  ;;  %p828_p10 = scmp.lt.s32.totalorder %s1091_s23, %s826_s11 }
  0x43   : > { %p824_p0 = pneg %p823_p11  ;;  %p829_p13 = scmp.lt.s32.totalorder %s827_s19, %s821_s7 }
  0x45   : > { %p830_p1 = por %p829_p13, %p828_p10 }
  0x47   : > { %p831_p3 = pnand %p830_p1, %p824_p0 }
  0x5c   : > { %231 = vxpose.xlu0.c.b16.start.end [1/1] (short) %v214_v5, 128 }
  0x65   : > { %790 = vset.pattern.permute.xlu0 %v909_v22 }
  0x81   : > { %527 = vperm.xlu0 %790, %v524_v23  }
  0xa5   : > { %v223_v6 = vpop.trf.xlu0 }
  0xa6   : > { %685 = vmatprep.mubr.msk.bf16.mxu0 %vm247_vm0, %v223_v6 }
  0xa9   : > { %v224_v7 = vpop.trf.xlu0 }
  0xaa   : > { %686 = vmatmul.mubr.msk.bf16.vlgmr.msra.gmra.mrb[0].mxu0 %vm247_vm0, %v224_v7 }
  0xad   : > { %v225_v8 = vpop.trf.xlu0 }
  0xae   : > { %689 = vmatprep.mubr.msk.bf16.mxu0 %vm247_vm0, %v225_v8 }
  0xb1   : > { %v226_v9 = vpop.trf.xlu0 }
  0xb2   : > { %690 = vmatmul.mubr.msk.bf16.gmra.mrb[4].mxu0 %vm247_vm0, %v226_v9 }
  0xb5   : > { %v227_v10 = vpop.trf.xlu0 }
  0xb6   : > { %693 = vmatprep.mubr.msk.bf16.mxu0 %vm247_vm0, %v227_v10 }
  0xb9   : > { %v228_v11 = vpop.trf.xlu0 }
  0xba   : > { %694 = vmatmul.mubr.msk.bf16.gmra.mrb[8].mxu0 %vm247_vm0, %v228_v11 }
  0xbd   : > { %v229_v12 = vpop.trf.xlu0 }
  0xbe   : > { %697 = vmatprep.mubr.msk.bf16.mxu0 %vm247_vm0, %v229_v12 }
  0xc1   : > { %v230_v13 = vpop.trf.xlu0 }
  0xc2   : > { %698 = vmatmul.mubr.msk.bf16.gmra.mrb[12].mxu0 %vm247_vm0, %v230_v13 }
  0xc5   : > { %v239_v14 = vpop.trf.xlu0 }
  0xc6   : > { %701 = vmatprep.mubr.msk.bf16.mxu1 %vm247_vm0, %v239_v14 }
  0xc9   : > { %v240_v15 = vpop.trf.xlu0 }
  0xca   : > { %702 = vmatmul.mubr.msk.bf16.vlgmr.msra.gmra.mrb[0].mxu1 %vm247_vm0, %v240_v15 }
  0xcd   : > { %v241_v16 = vpop.trf.xlu0 }
  0xce   : > { %705 = vmatprep.mubr.msk.bf16.mxu1 %vm247_vm0, %v241_v16 }
  0xd1   : > { %v242_v17 = vpop.trf.xlu0 }
  0xd2   : > { %706 = vmatmul.mubr.msk.bf16.gmra.mrb[4].mxu1 %vm247_vm0, %v242_v17 }
  0xd5   : > { %v243_v18 = vpop.trf.xlu0 }
  0xd6   : > { %709 = vmatprep.mubr.msk.bf16.mxu1 %vm247_vm0, %v243_v18 }
  0xd9   : > { %v244_v19 = vpop.trf.xlu0 }
  0xda   : > { %710 = vmatmul.mubr.msk.bf16.gmra.mrb[8].mxu1 %vm247_vm0, %v244_v19 }
  0xdd   : > { %v245_v20 = vpop.trf.xlu0 }
  0xde   : > { %713 = vmatprep.mubr.msk.bf16.mxu1 %vm247_vm0, %v245_v20 }
  0xe1   : > { %v246_v21 = vpop.trf.xlu0 }
  0xe2   : > { %714 = vmatmul.mubr.msk.bf16.gmra.mrb[12].mxu1 %vm247_vm0, %v246_v21 }
 0x100   : > { %v528_v56 = vpop.permute.xlu0 %527 }
 0x17d   : > { %v687_v24 = vpop.f32.mrb[0].mxu0 }
 0x17e   : > { %v333_v25 = vpop.f32.mrb[1].mxu0 }
 0x17f   : > { %460 = vxpose.xlu1.b32.start [1/16] (narrow) %v333_v25, 8  ;;  %v688_v26 = vpop.f32.mrb[2].mxu0 }
 0x180   : > { %v336_v27 = vpop.f32.mrb[3].mxu0 }
 0x183   : > { %461 = vxpose.xlu1.b32.cont [2/16] (narrow) %v336_v27, 8 }
 0x185   : > { %v691_v28 = vpop.f32.mrb[4].mxu0 }
 0x186   : > { %v349_v29 = vpop.f32.mrb[5].mxu0 }
 0x187   : > { %462 = vxpose.xlu1.b32.cont [3/16] (narrow) %v687_v24, 8  ;;  %v692_v30 = vpop.f32.mrb[6].mxu0 }
 0x188   : > { %v352_v31 = vpop.f32.mrb[7].mxu0 }
 0x18b   : > { %463 = vxpose.xlu1.b32.cont [4/16] (narrow) %v688_v26, 8 }
 0x18d   : > { %v695_v32 = vpop.f32.mrb[8].mxu0 }
 0x18e   : > { %v365_v33 = vpop.f32.mrb[9].mxu0 }
 0x18f   : > { %464 = vxpose.xlu1.b32.cont [5/16] (narrow) %v349_v29, 8  ;;  %v696_v34 = vpop.f32.mrb[10].mxu0 }
 0x190   : > { %v368_v35 = vpop.f32.mrb[11].mxu0 }
 0x193   : > { %465 = vxpose.xlu1.b32.cont [6/16] (narrow) %v352_v31, 8 }
 0x195   : > { %v699_v36 = vpop.f32.mrb[12].mxu0 }
 0x196   : > { %v381_v37 = vpop.f32.mrb[13].mxu0 }
 0x197   : > { %466 = vxpose.xlu1.b32.cont [7/16] (narrow) %v691_v28, 8  ;;  %v700_v38 = vpop.f32.mrb[14].mxu0 }
 0x198   : > { %v384_v39 = vpop.f32.mrb[15].mxu0 }
 0x19b   : > { %467 = vxpose.xlu1.b32.cont [8/16] (narrow) %v692_v30, 8 }
 0x19d   : > { %v703_v40 = vpop.f32.mrb[0].mxu1 }
 0x19e   : > { %v397_v41 = vpop.f32.mrb[1].mxu1 }
 0x19f   : > { %468 = vxpose.xlu1.b32.cont [9/16] (narrow) %v365_v33, 8  ;;  %v704_v42 = vpop.f32.mrb[2].mxu1 }
 0x1a0   : > { %v400_v43 = vpop.f32.mrb[3].mxu1 }
 0x1a3   : > { %469 = vxpose.xlu1.b32.cont [10/16] (narrow) %v368_v35, 8 }
 0x1a5   : > { %v707_v44 = vpop.f32.mrb[4].mxu1 }
 0x1a6   : > { %v413_v45 = vpop.f32.mrb[5].mxu1 }
 0x1a7   : > { %470 = vxpose.xlu1.b32.cont [11/16] (narrow) %v695_v32, 8  ;;  %v708_v46 = vpop.f32.mrb[6].mxu1 }
 0x1a8   : > { %v416_v47 = vpop.f32.mrb[7].mxu1 }
 0x1ab   : > { %471 = vxpose.xlu1.b32.cont [12/16] (narrow) %v696_v34, 8 }
 0x1ad   : > { %v711_v48 = vpop.f32.mrb[8].mxu1 }
 0x1ae   : > { %v429_v49 = vpop.f32.mrb[9].mxu1 }
 0x1af   : > { %472 = vxpose.xlu1.b32.cont [13/16] (narrow) %v381_v37, 8  ;;  %v712_v50 = vpop.f32.mrb[10].mxu1 }
 0x1b0   : > { %v432_v51 = vpop.f32.mrb[11].mxu1 }
 0x1b3   : > { %473 = vxpose.xlu1.b32.cont [14/16] (narrow) %v384_v39, 8 }
 0x1b5   : > { %v715_v52 = vpop.f32.mrb[12].mxu1 }
 0x1b6   : > { %v445_v53 = vpop.f32.mrb[13].mxu1 }
 0x1b7   : > { %474 = vxpose.xlu1.b32.cont [15/16] (narrow) %v699_v36, 8  ;;  %v716_v54 = vpop.f32.mrb[14].mxu1 }
 0x1b8   : > { %v448_v55 = vpop.f32.mrb[15].mxu1 }
 0x1bb   : > { %475 = vxpose.xlu1.b32.end [16/16] (narrow) %v700_v38, 8 }
 0x1bf   : > { %492 = vxpose.xlu1.b32.start [1/16] (narrow) %v397_v41, 8 }
 0x1c3   : > { %493 = vxpose.xlu1.b32.cont [2/16] (narrow) %v400_v43, 8 }
 0x1c7   : > { %494 = vxpose.xlu1.b32.cont [3/16] (narrow) %v703_v40, 8 }
 0x1cb   : > { %495 = vxpose.xlu1.b32.cont [4/16] (narrow) %v704_v42, 8 }
 0x1cf   : > { %496 = vxpose.xlu1.b32.cont [5/16] (narrow) %v413_v45, 8 }
 0x1d3   : > { %497 = vxpose.xlu1.b32.cont [6/16] (narrow) %v416_v47, 8 }
 0x1d7   : > { %498 = vxpose.xlu1.b32.cont [7/16] (narrow) %v707_v44, 8 }
 0x1db   : > { %499 = vxpose.xlu1.b32.cont [8/16] (narrow) %v708_v46, 8 }
 0x1df   : > { %500 = vxpose.xlu1.b32.cont [9/16] (narrow) %v429_v49, 8 }
 0x1e3   : > { %501 = vxpose.xlu1.b32.cont [10/16] (narrow) %v432_v51, 8 }
 0x1e7   : > { %502 = vxpose.xlu1.b32.cont [11/16] (narrow) %v711_v48, 8 }
 0x1eb   : > { %503 = vxpose.xlu1.b32.cont [12/16] (narrow) %v712_v50, 8 }
 0x1ef   : > { %504 = vxpose.xlu1.b32.cont [13/16] (narrow) %v445_v53, 8 }
 0x1f3   : > { %505 = vxpose.xlu1.b32.cont [14/16] (narrow) %v448_v55, 8 }
 0x1f7   : > { %506 = vxpose.xlu1.b32.cont [15/16] (narrow) %v715_v52, 8 }
 0x1fb   : > { %507 = vxpose.xlu1.b32.end [16/16] (narrow) %v716_v54, 8 }
 0x1ff   : > { %v476_v57 = vpop.trf.xlu1 }
 0x200   : > { %v530_v58 = vadd.f32 %v528_v56, %v476_v57 }
 0x202   : > { %v532_v59 = vadd.f32 %v530_v58, %v1054_v0 }
 0x204   : > { %534 = vst [vmem:[%s206_s10] sm:$0xf] %v532_v59 }
 0x23f   : > { %v508_v60 = vpop.trf.xlu1 }
 0x240   : > { %v531_v61 = vadd.f32 %v528_v56, %v508_v60 }
 0x242   : > { %v533_v62 = vadd.f32 %v531_v61, %v1064_v4 }
 0x244   : > { %535 = vst [vmem:[%s206_s10 + $0x4] sm:$0xf] %v533_v62 }
 0x245   : > { %834 = shalt.err (!%p831_p3)
}
 0x246   : > { %s835_s21 = scalar_lea.hbm %s1096_s4, 128  ;;  %s839_s8 = scalar_lea.hbm %s1149_s3, 256 }
 0x247   : > { %p836_p4 = scmp.ne.s32.totalorder %s1096_s4, %s835_s21  ;;  %p840_p12 = scmp.lt.u32.totalorder %s1096_s4, %s1149_s3 }
 0x248   : > { %p841_p2 = scmp.lt.u32.totalorder %s839_s8, %s835_s21  ;;  %p843_p8 = scmp.lt.u32.totalorder %s835_s21, %s1096_s4 }
 0x249   : > { %p837_p6 = pnand %p836_p4, %p1156_p9 }
 0x24a   : > { %p842_p5 = por %p841_p2, %p840_p12 }
 0x24b   : > { %p838_p7 = pneg %p837_p6 }
 0x24c   : > { %p844_p11 = por %p843_p8, %p842_p5 }
 0x24e   : > { %p845_p0 = pnand %p844_p11, %p838_p7 }
 0x250   : > { %848 = shalt.err (!%p845_p0)
}
 0x251   : > { %s911_s10 = smov 64   ;;  %s912_s28 = smov 128  }
 0x252   : > { %s913_s29 = smov 4  }
 0x253   : > { %723 = dma.vmem_to_hbm [thread:$0]  (%p1156_p9), %s1091_s23, 128, %s1096_s4, %s537_s5, %s911_s10, %s912_s28, %s913_s29  }
 0x254 PF: > { %s567_s30 = sand.u32 1, %s883_s12   ;;  %p1157_p10 = scmp.ne.s32.totalorder %s1154_s27, 0 }
 0x255   : > { %p1158_p13 = scmp.ge.s32.totalorder %s903_s17, 2  ;;  %s568_s7 = scalar_lea.sflag [#allocation4], %s567_s30 }
 0x257   : > { %p730_p1 = pnand %p1158_p13, %p1157_p10 }
 0x259   : > { %878 = dma.done.wait (!%p730_p1), %s568_s7, 128  }
 0x25a   : > { %880 = vsyncadd (!%p730_p1), %s568_s7, 4294967168  ;;  %s19_s17 = sadd.s32 1, %s903_s17   ;;  %s1159_s12 = smov %s887_s13 }
 0x25b   : > { %p16_p3 = scmp.ge.s32.totalorder %s19_s17, 4   ;;  %s1160_s13 = smov %s891_s14 }
 0x25c   : > { %s1161_s14 = smov %s990_s26  ;;  %s1162_s15 = smov %s899_s16 }
 0x25d   : > { %s1163_s16 = smov %s1165_s20  ;;  %18 = sbr.rel (!%p16_p3) target bundleno = 6 (0x6), region = 77 }
 0x264   :  { %573 = vsyncpa [#allocation3], 1 }
 0x265   :  { %575 = vsyncpa [#allocation3 + $0x1], 1 }
 0x266   :  { %576 = vsyncpa [#allocation4], 1 }
 0x267   :  { %578 = vsyncpa [#allocation4 + $0x1], 1 }

</bundles_post_ra>
